<compile_context>
chip_gen: v5e
topology: v5e:2x2
jax: 0.10.0
libtpu: 0.0.40
codegen_flags: <defaults>
</compile_context>

<pallas_src>
import math
import functools

import jax
import jax.numpy as jnp
from jax import lax
from jax.experimental import pallas as pl
from jax.experimental.pallas import tpu as pltpu

_LOG2E = math.log2(math.e)


def _choose_tile(dim, unit, target):
    """Largest multiple of `unit` that divides `dim` and is <= target, else `dim`.

    A tile equal to the full dim is always layout-legal; a multiple of `unit`
    satisfies the (8, 128) block constraints on the last two dims.
    """
    if dim <= target:
        return dim
    t = (target // unit) * unit
    while t >= unit:
        if dim % t == 0:
            return t
        t -= unit
    # TODO(synk): ragged S (no nice divisor) falls back to the full dimension.
    return dim


def _choose_head_group(H, Dh):
    """Pick Hb | H so Hb*Dh is a lane-dense multiple of 128 (fallback Hb=H)."""
    hb = None
    for cand in range(1, H + 1):
        if H % cand == 0 and cand * Dh >= 128 and (cand * Dh) % 128 == 0:
            hb = cand
            break
    if hb is None:
        return H  # Hb*Dh == H*Dh == full last dim -> always legal
    # Amortize per-step overhead a bit more while the tiles stay cheap.
    while H % (hb * 2) == 0 and (hb * 2) * Dh <= 256:
        hb *= 2
    return hb


def _flash_bias_kernel(q_ref, k_ref, v_ref, bias_ref, o_ref,
                       acc_sc, m_sc, l_sc, *, hb, dh):
    """Online-softmax attention over one (q-tile, kv-tile, head-group) step.

    q already carries scale*log2(e); bias already carries log2(e) -> all
    exponentials are plain exp2 on the EUP, no VALU multiplies on (tq,tk).
    """
    kj = pl.program_id(3)

    @pl.when(kj == 0)
    def _init():
        # Finite "-inf" so a fully-masked kv tile never yields exp(-inf+inf)=NaN.
        m_sc[...] = jnp.full(m_sc.shape, -1e30, dtype=m_sc.dtype)
        l_sc[...] = jnp.zeros(l_sc.shape, dtype=l_sc.dtype)
        acc_sc[...] = jnp.zeros(acc_sc.shape, dtype=acc_sc.dtype)

    for h in range(hb):
        lo = h * dh
        hi = lo + dh
        # Static ref slices (zero-cost views, within one 128-lane tile): only
        # this head's operands are live -> low vreg pressure across the loop.
        q = q_ref[0, :, lo:hi]        # (tq, dh) bf16, scale*log2e folded in
        k = k_ref[0, :, lo:hi]        # (tk, dh) bf16
        v = v_ref[0, :, lo:hi]        # (tk, dh) bf16
        b = bias_ref[0, h]            # (tq, tk) bf16, already * log2e

        # scores in the log2 domain: s = (q·k^T)*scale*log2e + bias*log2e.
        # Contract last dims directly (no k.T relayout); bf16 operands, f32 acc.
        s = lax.dot_general(q, k, (((1,), (1,)), ((), ())),
                            preferred_element_type=jnp.float32)
        s = s + b                      # bf16 bias upcast in-register, no f32 tile

        m_prev = m_sc[h]                                       # (tq, 1) f32
        m_new = jnp.maximum(m_prev, jnp.max(s, axis=-1, keepdims=True))
        alpha = jnp.exp2(m_prev - m_new)
        p = jnp.exp2(s - m_new)
        l_sc[h] = alpha * l_sc[h] + jnp.sum(p, axis=-1, keepdims=True)
        acc_sc[:, lo:hi] = alpha * acc_sc[:, lo:hi] + jnp.dot(
            p.astype(v.dtype), v, preferred_element_type=jnp.float32)
        m_sc[h] = m_new

    @pl.when(kj == pl.num_programs(3) - 1)
    def _finalize():
        for h in range(hb):
            lo = h * dh
            hi = lo + dh
            # Approximate reciprocal runs on the EUP slot (off the VALU path).
            # NOTE: a fully-masked row (l == 0) gives NaN, same as dense softmax.
            inv = pl.reciprocal(l_sc[h], approx=True)
            o_ref[0, :, lo:hi] = (acc_sc[:, lo:hi] * inv).astype(o_ref.dtype)


def _local_attention_pallas(q, k, v, bias, H, Dh, out_dtype):
    """q/k/v: [B, S, H*Dh] (bf16); bias: [B, H, S, S] (bf16) -> out [B, S, H*Dh]."""
    B, S, HD = q.shape
    assert HD == H * Dh

    hb = _choose_head_group(H, Dh)
    G = H // hb
    tq = _choose_tile(S, 8, 128)     # query tile (sublane axis of scores)
    tk = _choose_tile(S, 128, 512)   # key tile (lane axis of scores/bias)
    assert S % tq == 0 and S % tk == 0

    kernel = functools.partial(_flash_bias_kernel, hb=hb, dh=Dh)

    qo_spec = pl.BlockSpec((1, tq, hb * Dh), lambda b, g, i, j: (b, i, g))
    kv_spec = pl.BlockSpec((1, tk, hb * Dh), lambda b, g, i, j: (b, j, g))
    bias_spec = pl.BlockSpec((1, hb, tq, tk), lambda b, g, i, j: (b, g, i, j))

    return pl.pallas_call(
        kernel,
        out_shape=jax.ShapeDtypeStruct((B, S, HD), out_dtype),
        grid_spec=pltpu.PrefetchScalarGridSpec(
            num_scalar_prefetch=0,
            grid=(B, G, S // tq, S // tk),
            in_specs=[qo_spec, kv_spec, kv_spec, bias_spec],
            out_specs=qo_spec,
            scratch_shapes=[
                pltpu.VMEM((tq, hb * Dh), jnp.float32),  # lane-dense acc
                pltpu.VMEM((hb, tq, 1), jnp.float32),    # running max m (padded, small)
                pltpu.VMEM((hb, tq, 1), jnp.float32),    # running sum l (padded, small)
            ],
        ),
        compiler_params=pltpu.CompilerParams(
            dimension_semantics=("parallel", "parallel", "parallel", "arbitrary"),
        ),
    )(q, k, v, bias)


def distributed_attention_local_bias_forward(query, key, value, attn_bias,
                                             edge_index=None,
                                             scatter_idx=2, gather_idx=1,
                                             compute_dtype=jnp.bfloat16):
    """Forward of DistributedAttentionLocalBias with sequence-parallel
    world_size == 1.

    query/key/value : [B, S, H, Dh]   (gather_idx=1 is seq, scatter_idx=2 is head)
    attn_bias       : [B, H, S, S]
    returns         : [B, S, H, Dh]  (in query.dtype)
    """
    del edge_index  # unused by generic dense bias attention
    B, S, H, Dh = query.shape
    scale = 1.0 / math.sqrt(Dh)

    # _SeqAllToAll (world_size=1) -> identity; merge_global_token0 -> identity;
    # _SeqScatter on attn_bias (world_size=1) -> identity.
    # Only free reshapes (no transposes): [B, S, H, Dh] <-> [B, S, H*Dh].
    #
    # bf16 compute halves the dominant bias HBM stream and the q/k/v DMAs
    # while the kernel keeps f32 accumulation.  scale*log2(e) (for q) and
    # log2(e) (for bias) are folded here so they fuse into the convert passes
    # (no extra HBM round trip, no per-step (tq,tk) multiplies in the kernel).
    q2 = (query.reshape(B, S, H * Dh).astype(jnp.float32)
          * (scale * _LOG2E)).astype(compute_dtype)
    k2 = key.reshape(B, S, H * Dh).astype(compute_dtype)
    v2 = value.reshape(B, S, H * Dh).astype(compute_dtype)
    b2 = (attn_bias.astype(jnp.float32) * _LOG2E).astype(compute_dtype)

    ctx2 = _local_attention_pallas(q2, k2, v2, b2, H, Dh, out_dtype=query.dtype)

    # extend_global_token0 -> identity; final _SeqAllToAll -> identity.
    return ctx2.reshape(B, S, H, Dh)


def _reference_forward(query, key, value, attn_bias, compute_dtype=jnp.bfloat16):
    """Pure-JAX reference (f32 math on bf16-rounded inputs, matching the
    kernel's compute precision)."""
    B, S, H, Dh = query.shape
    scale = 1.0 / math.sqrt(Dh)
    q = query.astype(compute_dtype).astype(jnp.float32)
    k = key.astype(compute_dtype).astype(jnp.float32)
    v = value.astype(compute_dtype).astype(jnp.float32)
    b = attn_bias.astype(compute_dtype).astype(jnp.float32)
    q = jnp.transpose(q, (0, 2, 1, 3))
    k = jnp.transpose(k, (0, 2, 1, 3))
    v = jnp.transpose(v, (0, 2, 1, 3))
    s = jnp.einsum("bhqd,bhkd->bhqk", q, k) * scale + b
    p = jax.nn.softmax(s, axis=-1)
    o = jnp.einsum("bhqk,bhkd->bhqd", p, v)
    return jnp.transpose(o, (0, 2, 1, 3)).astype(query.dtype)


if __name__ == "__main__":
    fwd = jax.jit(distributed_attention_local_bias_forward)

    # bf16-compute tolerance: inputs and the P@V operands are rounded to bf16
    # inside the kernel; errors are O(1e-2) on O(1) outputs at S=512.
    ATOL = RTOL = 3e-2

    # --- small-shape check (single tile, Hb = H = 4 -> 128-lane tiles) ---
    B, S, H, Dh = 2, 16, 4, 32
    key0 = jax.random.PRNGKey(0)
    kq, kk, kv, kb = jax.random.split(key0, 4)
    query = jax.random.normal(kq, (B, S, H, Dh), dtype=jnp.float32)
    key_t = jax.random.normal(kk, (B, S, H, Dh), dtype=jnp.float32)
    value = jax.random.normal(kv, (B, S, H, Dh), dtype=jnp.float32)
    attn_bias = 0.1 * jax.random.normal(kb, (B, H, S, S), dtype=jnp.float32)
    edge_index = jnp.zeros((2, 10), dtype=jnp.int32)  # accepted but unused

    out = fwd(query, key_t, value, attn_bias, edge_index)
    out = jax.block_until_ready(out)
    ref = _reference_forward(query, key_t, value, attn_bias)
    assert out.shape == (B, S, H, Dh)
    assert jnp.allclose(out, ref, atol=ATOL, rtol=RTOL), (
        "Pallas output mismatch vs reference (small shape)")

    # --- tiled check (multiple q tiles, Hb=8 head group, bf16 bias stream) ---
    B2, S2, H2, Dh2 = 1, 512, 8, 32
    k2q, k2k, k2v, k2b = jax.random.split(jax.random.PRNGKey(1), 4)
    query2 = jax.random.normal(k2q, (B2, S2, H2, Dh2), dtype=jnp.float32)
    key2 = jax.random.normal(k2k, (B2, S2, H2, Dh2), dtype=jnp.float32)
    value2 = jax.random.normal(k2v, (B2, S2, H2, Dh2), dtype=jnp.float32)
    attn_bias2 = 0.1 * jax.random.normal(k2b, (B2, H2, S2, S2), dtype=jnp.float32)

    out2 = fwd(query2, key2, value2, attn_bias2, edge_index)
    out2 = jax.block_until_ready(out2)
    ref2 = _reference_forward(query2, key2, value2, attn_bias2)
    assert out2.shape == (B2, S2, H2, Dh2)
    assert jnp.allclose(out2, ref2, atol=ATOL, rtol=RTOL), (
        "Pallas output mismatch vs reference (tiled shape)")

    print("KERNEL_OK")
</pallas_src>

<mosaic_0001>
module attributes {stable_mosaic.version = 11 : i64} {
  func.func @_flash_bias_kernel(%arg0: i32, %arg1: i32, %arg2: i32, %arg3: i32, %arg4: memref<1x16x128xbf16, #tpu.memory_space<vmem>>, %arg5: memref<1x16x128xbf16, #tpu.memory_space<vmem>>, %arg6: memref<1x16x128xbf16, #tpu.memory_space<vmem>>, %arg7: memref<1x4x16x16xbf16, #tpu.memory_space<vmem>>, %arg8: memref<1x16x128xf32, #tpu.memory_space<vmem>>, %arg9: memref<16x128xf32, #tpu.memory_space<vmem>>, %arg10: memref<4x16x1xf32, #tpu.memory_space<vmem>>, %arg11: memref<4x16x1xf32, #tpu.memory_space<vmem>>) attributes {dimension_semantics = [#tpu.dimension_semantics<parallel>, #tpu.dimension_semantics<parallel>, #tpu.dimension_semantics<parallel>, #tpu.dimension_semantics<arbitrary>], iteration_bounds = array<i64: 2, 1, 1, 1>, scalar_prefetch = 0 : i64, scratch_operands = 3 : i64, tpu.core_type = #tpu.core_type<tc>, window_params = [{transform_indices = @transform_0, window_bounds = array<i64: 1, 16, 128>}, {transform_indices = @transform_1, window_bounds = array<i64: 1, 16, 128>}, {transform_indices = @transform_2, window_bounds = array<i64: 1, 16, 128>}, {transform_indices = @transform_3, window_bounds = array<i64: 1, 4, 16, 16>}, {transform_indices = @transform_4, window_bounds = array<i64: 1, 16, 128>}]} {
    %c0_i32 = arith.constant 0 : i32
    %0 = arith.cmpi eq, %arg3, %c0_i32 : i32
    %1 = arith.extui %0 : i1 to i32
    %c0_i32_0 = arith.constant 0 : i32
    %2 = arith.cmpi ne, %1, %c0_i32_0 : i32
    scf.if %2 {
      %cst_127 = arith.constant -1.000000e+30 : f32
      %166 = vector.broadcast %cst_127 : f32 to vector<4x16x1xf32>
      %c0_128 = arith.constant 0 : index
      %c0_129 = arith.constant 0 : index
      %c0_130 = arith.constant 0 : index
      %167 = vector.load %arg10[%c0_128, %c0_129, %c0_130] : memref<4x16x1xf32, #tpu.memory_space<vmem>>, vector<4x16x1xf32>
      tpu.vector_store %arg10[%c0_128, %c0_129, %c0_130], %166 {strides = array<i32>} : memref<4x16x1xf32, #tpu.memory_space<vmem>>, vector<4x16x1xf32>,
      %cst_131 = arith.constant 0.000000e+00 : f32
      %168 = vector.broadcast %cst_131 : f32 to vector<4x16x1xf32>
      %c0_132 = arith.constant 0 : index
      %c0_133 = arith.constant 0 : index
      %c0_134 = arith.constant 0 : index
      %169 = vector.load %arg11[%c0_132, %c0_133, %c0_134] : memref<4x16x1xf32, #tpu.memory_space<vmem>>, vector<4x16x1xf32>
      tpu.vector_store %arg11[%c0_132, %c0_133, %c0_134], %168 {strides = array<i32>} : memref<4x16x1xf32, #tpu.memory_space<vmem>>, vector<4x16x1xf32>,
      %cst_135 = arith.constant 0.000000e+00 : f32
      %170 = vector.broadcast %cst_135 : f32 to vector<16x128xf32>
      %c0_136 = arith.constant 0 : index
      %c0_137 = arith.constant 0 : index
      %171 = vector.load %arg9[%c0_136, %c0_137] : memref<16x128xf32, #tpu.memory_space<vmem>>, vector<16x128xf32>
      tpu.vector_store %arg9[%c0_136, %c0_137], %170 {strides = array<i32>} : memref<16x128xf32, #tpu.memory_space<vmem>>, vector<16x128xf32>,
    } else {
    }
    %c0 = arith.constant 0 : index
    %c0_1 = arith.constant 0 : index
    %c0_2 = arith.constant 0 : index
    %3 = vector.load %arg4[%c0, %c0_1, %c0_2] : memref<1x16x128xbf16, #tpu.memory_space<vmem>>, vector<1x16x32xbf16>
    %4 = vector.shape_cast %3 : vector<1x16x32xbf16> to vector<16x32xbf16>
    %c0_3 = arith.constant 0 : index
    %c0_4 = arith.constant 0 : index
    %c0_5 = arith.constant 0 : index
    %5 = vector.load %arg5[%c0_3, %c0_4, %c0_5] : memref<1x16x128xbf16, #tpu.memory_space<vmem>>, vector<1x16x32xbf16>
    %6 = vector.shape_cast %5 : vector<1x16x32xbf16> to vector<16x32xbf16>
    %c0_6 = arith.constant 0 : index
    %c0_7 = arith.constant 0 : index
    %c0_8 = arith.constant 0 : index
    %7 = vector.load %arg6[%c0_6, %c0_7, %c0_8] : memref<1x16x128xbf16, #tpu.memory_space<vmem>>, vector<1x16x32xbf16>
    %8 = vector.shape_cast %7 : vector<1x16x32xbf16> to vector<16x32xbf16>
    %c0_9 = arith.constant 0 : index
    %c0_10 = arith.constant 0 : index
    %c0_11 = arith.constant 0 : index
    %c0_12 = arith.constant 0 : index
    %9 = vector.load %arg7[%c0_9, %c0_10, %c0_11, %c0_12] : memref<1x4x16x16xbf16, #tpu.memory_space<vmem>>, vector<1x1x16x16xbf16>
    %10 = vector.shape_cast %9 : vector<1x1x16x16xbf16> to vector<16x16xbf16>
    %cst = arith.constant dense<0.000000e+00> : vector<16x16xf32>
    %11 = tpu.matmul %4, %6, %cst {dimension_numbers = #tpu.dot_dimension_numbers<[1], [1], [0], [0], [0, 0, 1, 0], [], []>} : vector<16x32xbf16>, vector<16x32xbf16>, vector<16x16xf32> -> vector<16x16xf32>
    %12 = arith.extf %10 : vector<16x16xbf16> to vector<16x16xf32>
    %13 = arith.addf %11, %12 : vector<16x16xf32>
    %c0_13 = arith.constant 0 : index
    %c0_14 = arith.constant 0 : index
    %c0_15 = arith.constant 0 : index
    %14 = vector.load %arg10[%c0_13, %c0_14, %c0_15] : memref<4x16x1xf32, #tpu.memory_space<vmem>>, vector<1x16x1xf32>
    %15 = vector.shape_cast %14 : vector<1x16x1xf32> to vector<16x1xf32>
    %cst_16 = arith.constant dense<0xFF800000> : vector<16xf32>
    %16 = vector.multi_reduction <maximumf>, %13, %cst_16 [1] : vector<16x16xf32> to vector<16xf32>
    %17 = vector.shape_cast %16 : vector<16xf32> to vector<16x1xf32>
    %18 = arith.maximumf %15, %17 : vector<16x1xf32>
    %19 = arith.subf %15, %18 : vector<16x1xf32>
    %20 = math.exp2 %19 : vector<16x1xf32>
    %21 = vector.broadcast %18 : vector<16x1xf32> to vector<16x16xf32>
    %22 = arith.subf %13, %21 : vector<16x16xf32>
    %23 = math.exp2 %22 : vector<16x16xf32>
    %c0_17 = arith.constant 0 : index
    %c0_18 = arith.constant 0 : index
    %c0_19 = arith.constant 0 : index
    %24 = vector.load %arg11[%c0_17, %c0_18, %c0_19] : memref<4x16x1xf32, #tpu.memory_space<vmem>>, vector<1x16x1xf32>
    %25 = vector.shape_cast %24 : vector<1x16x1xf32> to vector<16x1xf32>
    %26 = arith.mulf %20, %25 : vector<16x1xf32>
    %cst_20 = arith.constant dense<0.000000e+00> : vector<16xf32>
    %27 = vector.multi_reduction <add>, %23, %cst_20 [1] : vector<16x16xf32> to vector<16xf32>
    %28 = vector.shape_cast %27 : vector<16xf32> to vector<16x1xf32>
    %29 = arith.addf %26, %28 : vector<16x1xf32>
    %c0_21 = arith.constant 0 : index
    %c0_22 = arith.constant 0 : index
    %c0_23 = arith.constant 0 : index
    %30 = vector.load %arg11[%c0_21, %c0_22, %c0_23] : memref<4x16x1xf32, #tpu.memory_space<vmem>>, vector<1x16x1xf32>
    %31 = vector.shape_cast %30 : vector<1x16x1xf32> to vector<16x1xf32>
    %32 = vector.shape_cast %29 : vector<16x1xf32> to vector<1x16x1xf32>
    tpu.vector_store %arg11[%c0_21, %c0_22, %c0_23], %32 {strides = array<i32>} : memref<4x16x1xf32, #tpu.memory_space<vmem>>, vector<1x16x1xf32>,
    %c0_24 = arith.constant 0 : index
    %c0_25 = arith.constant 0 : index
    %33 = vector.load %arg9[%c0_24, %c0_25] : memref<16x128xf32, #tpu.memory_space<vmem>>, vector<16x32xf32>
    %34 = vector.broadcast %20 : vector<16x1xf32> to vector<16x32xf32>
    %35 = arith.mulf %34, %33 : vector<16x32xf32>
    %36 = arith.truncf %23 : vector<16x16xf32> to vector<16x16xbf16>
    %cst_26 = arith.constant dense<0.000000e+00> : vector<16x32xf32>
    %37 = tpu.matmul %36, %8, %cst_26 {dimension_numbers = #tpu.dot_dimension_numbers<[1], [0], [0], [1], [0, 0, 1, 1], [], []>} : vector<16x16xbf16>, vector<16x32xbf16>, vector<16x32xf32> -> vector<16x32xf32>
    %38 = arith.addf %35, %37 : vector<16x32xf32>
    %c0_27 = arith.constant 0 : index
    %c0_28 = arith.constant 0 : index
    %39 = vector.load %arg9[%c0_27, %c0_28] : memref<16x128xf32, #tpu.memory_space<vmem>>, vector<16x32xf32>
    tpu.vector_store %arg9[%c0_27, %c0_28], %38 {strides = array<i32>} : memref<16x128xf32, #tpu.memory_space<vmem>>, vector<16x32xf32>,
    %c0_29 = arith.constant 0 : index
    %c0_30 = arith.constant 0 : index
    %c0_31 = arith.constant 0 : index
    %40 = vector.load %arg10[%c0_29, %c0_30, %c0_31] : memref<4x16x1xf32, #tpu.memory_space<vmem>>, vector<1x16x1xf32>
    %41 = vector.shape_cast %40 : vector<1x16x1xf32> to vector<16x1xf32>
    %42 = vector.shape_cast %18 : vector<16x1xf32> to vector<1x16x1xf32>
    tpu.vector_store %arg10[%c0_29, %c0_30, %c0_31], %42 {strides = array<i32>} : memref<4x16x1xf32, #tpu.memory_space<vmem>>, vector<1x16x1xf32>,
    %c0_32 = arith.constant 0 : index
    %c0_33 = arith.constant 0 : index
    %c32 = arith.constant 32 : index
    %43 = vector.load %arg4[%c0_32, %c0_33, %c32] : memref<1x16x128xbf16, #tpu.memory_space<vmem>>, vector<1x16x32xbf16>
    %44 = vector.shape_cast %43 : vector<1x16x32xbf16> to vector<16x32xbf16>
    %c0_34 = arith.constant 0 : index
    %c0_35 = arith.constant 0 : index
    %c32_36 = arith.constant 32 : index
    %45 = vector.load %arg5[%c0_34, %c0_35, %c32_36] : memref<1x16x128xbf16, #tpu.memory_space<vmem>>, vector<1x16x32xbf16>
    %46 = vector.shape_cast %45 : vector<1x16x32xbf16> to vector<16x32xbf16>
    %c0_37 = arith.constant 0 : index
    %c0_38 = arith.constant 0 : index
    %c32_39 = arith.constant 32 : index
    %47 = vector.load %arg6[%c0_37, %c0_38, %c32_39] : memref<1x16x128xbf16, #tpu.memory_space<vmem>>, vector<1x16x32xbf16>
    %48 = vector.shape_cast %47 : vector<1x16x32xbf16> to vector<16x32xbf16>
    %c0_40 = arith.constant 0 : index
    %c1 = arith.constant 1 : index
    %c0_41 = arith.constant 0 : index
    %c0_42 = arith.constant 0 : index
    %49 = vector.load %arg7[%c0_40, %c1, %c0_41, %c0_42] : memref<1x4x16x16xbf16, #tpu.memory_space<vmem>>, vector<1x1x16x16xbf16>
    %50 = vector.shape_cast %49 : vector<1x1x16x16xbf16> to vector<16x16xbf16>
    %cst_43 = arith.constant dense<0.000000e+00> : vector<16x16xf32>
    %51 = tpu.matmul %44, %46, %cst_43 {dimension_numbers = #tpu.dot_dimension_numbers<[1], [1], [0], [0], [0, 0, 1, 0], [], []>} : vector<16x32xbf16>, vector<16x32xbf16>, vector<16x16xf32> -> vector<16x16xf32>
    %52 = arith.extf %50 : vector<16x16xbf16> to vector<16x16xf32>
    %53 = arith.addf %51, %52 : vector<16x16xf32>
    %c1_44 = arith.constant 1 : index
    %c0_45 = arith.constant 0 : index
    %c0_46 = arith.constant 0 : index
    %54 = vector.load %arg10[%c1_44, %c0_45, %c0_46] : memref<4x16x1xf32, #tpu.memory_space<vmem>>, vector<1x16x1xf32>
    %55 = vector.shape_cast %54 : vector<1x16x1xf32> to vector<16x1xf32>
    %cst_47 = arith.constant dense<0xFF800000> : vector<16xf32>
    %56 = vector.multi_reduction <maximumf>, %53, %cst_47 [1] : vector<16x16xf32> to vector<16xf32>
    %57 = vector.shape_cast %56 : vector<16xf32> to vector<16x1xf32>
    %58 = arith.maximumf %55, %57 : vector<16x1xf32>
    %59 = arith.subf %55, %58 : vector<16x1xf32>
    %60 = math.exp2 %59 : vector<16x1xf32>
    %61 = vector.broadcast %58 : vector<16x1xf32> to vector<16x16xf32>
    %62 = arith.subf %53, %61 : vector<16x16xf32>
    %63 = math.exp2 %62 : vector<16x16xf32>
    %c1_48 = arith.constant 1 : index
    %c0_49 = arith.constant 0 : index
    %c0_50 = arith.constant 0 : index
    %64 = vector.load %arg11[%c1_48, %c0_49, %c0_50] : memref<4x16x1xf32, #tpu.memory_space<vmem>>, vector<1x16x1xf32>
    %65 = vector.shape_cast %64 : vector<1x16x1xf32> to vector<16x1xf32>
    %66 = arith.mulf %60, %65 : vector<16x1xf32>
    %cst_51 = arith.constant dense<0.000000e+00> : vector<16xf32>
    %67 = vector.multi_reduction <add>, %63, %cst_51 [1] : vector<16x16xf32> to vector<16xf32>
    %68 = vector.shape_cast %67 : vector<16xf32> to vector<16x1xf32>
    %69 = arith.addf %66, %68 : vector<16x1xf32>
    %c1_52 = arith.constant 1 : index
    %c0_53 = arith.constant 0 : index
    %c0_54 = arith.constant 0 : index
    %70 = vector.load %arg11[%c1_52, %c0_53, %c0_54] : memref<4x16x1xf32, #tpu.memory_space<vmem>>, vector<1x16x1xf32>
    %71 = vector.shape_cast %70 : vector<1x16x1xf32> to vector<16x1xf32>
    %72 = vector.shape_cast %69 : vector<16x1xf32> to vector<1x16x1xf32>
    tpu.vector_store %arg11[%c1_52, %c0_53, %c0_54], %72 {strides = array<i32>} : memref<4x16x1xf32, #tpu.memory_space<vmem>>, vector<1x16x1xf32>,
    %c0_55 = arith.constant 0 : index
    %c32_56 = arith.constant 32 : index
    %73 = vector.load %arg9[%c0_55, %c32_56] : memref<16x128xf32, #tpu.memory_space<vmem>>, vector<16x32xf32>
    %74 = vector.broadcast %60 : vector<16x1xf32> to vector<16x32xf32>
    %75 = arith.mulf %74, %73 : vector<16x32xf32>
    %76 = arith.truncf %63 : vector<16x16xf32> to vector<16x16xbf16>
    %cst_57 = arith.constant dense<0.000000e+00> : vector<16x32xf32>
    %77 = tpu.matmul %76, %48, %cst_57 {dimension_numbers = #tpu.dot_dimension_numbers<[1], [0], [0], [1], [0, 0, 1, 1], [], []>} : vector<16x16xbf16>, vector<16x32xbf16>, vector<16x32xf32> -> vector<16x32xf32>
    %78 = arith.addf %75, %77 : vector<16x32xf32>
    %c0_58 = arith.constant 0 : index
    %c32_59 = arith.constant 32 : index
    %79 = vector.load %arg9[%c0_58, %c32_59] : memref<16x128xf32, #tpu.memory_space<vmem>>, vector<16x32xf32>
    tpu.vector_store %arg9[%c0_58, %c32_59], %78 {strides = array<i32>} : memref<16x128xf32, #tpu.memory_space<vmem>>, vector<16x32xf32>,
    %c1_60 = arith.constant 1 : index
    %c0_61 = arith.constant 0 : index
    %c0_62 = arith.constant 0 : index
    %80 = vector.load %arg10[%c1_60, %c0_61, %c0_62] : memref<4x16x1xf32, #tpu.memory_space<vmem>>, vector<1x16x1xf32>
    %81 = vector.shape_cast %80 : vector<1x16x1xf32> to vector<16x1xf32>
    %82 = vector.shape_cast %58 : vector<16x1xf32> to vector<1x16x1xf32>
    tpu.vector_store %arg10[%c1_60, %c0_61, %c0_62], %82 {strides = array<i32>} : memref<4x16x1xf32, #tpu.memory_space<vmem>>, vector<1x16x1xf32>,
    %c0_63 = arith.constant 0 : index
    %c0_64 = arith.constant 0 : index
    %c64 = arith.constant 64 : index
    %83 = vector.load %arg4[%c0_63, %c0_64, %c64] : memref<1x16x128xbf16, #tpu.memory_space<vmem>>, vector<1x16x32xbf16>
    %84 = vector.shape_cast %83 : vector<1x16x32xbf16> to vector<16x32xbf16>
    %c0_65 = arith.constant 0 : index
    %c0_66 = arith.constant 0 : index
    %c64_67 = arith.constant 64 : index
    %85 = vector.load %arg5[%c0_65, %c0_66, %c64_67] : memref<1x16x128xbf16, #tpu.memory_space<vmem>>, vector<1x16x32xbf16>
    %86 = vector.shape_cast %85 : vector<1x16x32xbf16> to vector<16x32xbf16>
    %c0_68 = arith.constant 0 : index
    %c0_69 = arith.constant 0 : index
    %c64_70 = arith.constant 64 : index
    %87 = vector.load %arg6[%c0_68, %c0_69, %c64_70] : memref<1x16x128xbf16, #tpu.memory_space<vmem>>, vector<1x16x32xbf16>
    %88 = vector.shape_cast %87 : vector<1x16x32xbf16> to vector<16x32xbf16>
    %c0_71 = arith.constant 0 : index
    %c2 = arith.constant 2 : index
    %c0_72 = arith.constant 0 : index
    %c0_73 = arith.constant 0 : index
    %89 = vector.load %arg7[%c0_71, %c2, %c0_72, %c0_73] : memref<1x4x16x16xbf16, #tpu.memory_space<vmem>>, vector<1x1x16x16xbf16>
    %90 = vector.shape_cast %89 : vector<1x1x16x16xbf16> to vector<16x16xbf16>
    %cst_74 = arith.constant dense<0.000000e+00> : vector<16x16xf32>
    %91 = tpu.matmul %84, %86, %cst_74 {dimension_numbers = #tpu.dot_dimension_numbers<[1], [1], [0], [0], [0, 0, 1, 0], [], []>} : vector<16x32xbf16>, vector<16x32xbf16>, vector<16x16xf32> -> vector<16x16xf32>
    %92 = arith.extf %90 : vector<16x16xbf16> to vector<16x16xf32>
    %93 = arith.addf %91, %92 : vector<16x16xf32>
    %c2_75 = arith.constant 2 : index
    %c0_76 = arith.constant 0 : index
    %c0_77 = arith.constant 0 : index
    %94 = vector.load %arg10[%c2_75, %c0_76, %c0_77] : memref<4x16x1xf32, #tpu.memory_space<vmem>>, vector<1x16x1xf32>
    %95 = vector.shape_cast %94 : vector<1x16x1xf32> to vector<16x1xf32>
    %cst_78 = arith.constant dense<0xFF800000> : vector<16xf32>
    %96 = vector.multi_reduction <maximumf>, %93, %cst_78 [1] : vector<16x16xf32> to vector<16xf32>
    %97 = vector.shape_cast %96 : vector<16xf32> to vector<16x1xf32>
    %98 = arith.maximumf %95, %97 : vector<16x1xf32>
    %99 = arith.subf %95, %98 : vector<16x1xf32>
    %100 = math.exp2 %99 : vector<16x1xf32>
    %101 = vector.broadcast %98 : vector<16x1xf32> to vector<16x16xf32>
    %102 = arith.subf %93, %101 : vector<16x16xf32>
    %103 = math.exp2 %102 : vector<16x16xf32>
    %c2_79 = arith.constant 2 : index
    %c0_80 = arith.constant 0 : index
    %c0_81 = arith.constant 0 : index
    %104 = vector.load %arg11[%c2_79, %c0_80, %c0_81] : memref<4x16x1xf32, #tpu.memory_space<vmem>>, vector<1x16x1xf32>
    %105 = vector.shape_cast %104 : vector<1x16x1xf32> to vector<16x1xf32>
    %106 = arith.mulf %100, %105 : vector<16x1xf32>
    %cst_82 = arith.constant dense<0.000000e+00> : vector<16xf32>
    %107 = vector.multi_reduction <add>, %103, %cst_82 [1] : vector<16x16xf32> to vector<16xf32>
    %108 = vector.shape_cast %107 : vector<16xf32> to vector<16x1xf32>
    %109 = arith.addf %106, %108 : vector<16x1xf32>
    %c2_83 = arith.constant 2 : index
    %c0_84 = arith.constant 0 : index
    %c0_85 = arith.constant 0 : index
    %110 = vector.load %arg11[%c2_83, %c0_84, %c0_85] : memref<4x16x1xf32, #tpu.memory_space<vmem>>, vector<1x16x1xf32>
    %111 = vector.shape_cast %110 : vector<1x16x1xf32> to vector<16x1xf32>
    %112 = vector.shape_cast %109 : vector<16x1xf32> to vector<1x16x1xf32>
    tpu.vector_store %arg11[%c2_83, %c0_84, %c0_85], %112 {strides = array<i32>} : memref<4x16x1xf32, #tpu.memory_space<vmem>>, vector<1x16x1xf32>,
    %c0_86 = arith.constant 0 : index
    %c64_87 = arith.constant 64 : index
    %113 = vector.load %arg9[%c0_86, %c64_87] : memref<16x128xf32, #tpu.memory_space<vmem>>, vector<16x32xf32>
    %114 = vector.broadcast %100 : vector<16x1xf32> to vector<16x32xf32>
    %115 = arith.mulf %114, %113 : vector<16x32xf32>
    %116 = arith.truncf %103 : vector<16x16xf32> to vector<16x16xbf16>
    %cst_88 = arith.constant dense<0.000000e+00> : vector<16x32xf32>
    %117 = tpu.matmul %116, %88, %cst_88 {dimension_numbers = #tpu.dot_dimension_numbers<[1], [0], [0], [1], [0, 0, 1, 1], [], []>} : vector<16x16xbf16>, vector<16x32xbf16>, vector<16x32xf32> -> vector<16x32xf32>
    %118 = arith.addf %115, %117 : vector<16x32xf32>
    %c0_89 = arith.constant 0 : index
    %c64_90 = arith.constant 64 : index
    %119 = vector.load %arg9[%c0_89, %c64_90] : memref<16x128xf32, #tpu.memory_space<vmem>>, vector<16x32xf32>
    tpu.vector_store %arg9[%c0_89, %c64_90], %118 {strides = array<i32>} : memref<16x128xf32, #tpu.memory_space<vmem>>, vector<16x32xf32>,
    %c2_91 = arith.constant 2 : index
    %c0_92 = arith.constant 0 : index
    %c0_93 = arith.constant 0 : index
    %120 = vector.load %arg10[%c2_91, %c0_92, %c0_93] : memref<4x16x1xf32, #tpu.memory_space<vmem>>, vector<1x16x1xf32>
    %121 = vector.shape_cast %120 : vector<1x16x1xf32> to vector<16x1xf32>
    %122 = vector.shape_cast %98 : vector<16x1xf32> to vector<1x16x1xf32>
    tpu.vector_store %arg10[%c2_91, %c0_92, %c0_93], %122 {strides = array<i32>} : memref<4x16x1xf32, #tpu.memory_space<vmem>>, vector<1x16x1xf32>,
    %c0_94 = arith.constant 0 : index
    %c0_95 = arith.constant 0 : index
    %c96 = arith.constant 96 : index
    %123 = vector.load %arg4[%c0_94, %c0_95, %c96] : memref<1x16x128xbf16, #tpu.memory_space<vmem>>, vector<1x16x32xbf16>
    %124 = vector.shape_cast %123 : vector<1x16x32xbf16> to vector<16x32xbf16>
    %c0_96 = arith.constant 0 : index
    %c0_97 = arith.constant 0 : index
    %c96_98 = arith.constant 96 : index
    %125 = vector.load %arg5[%c0_96, %c0_97, %c96_98] : memref<1x16x128xbf16, #tpu.memory_space<vmem>>, vector<1x16x32xbf16>
    %126 = vector.shape_cast %125 : vector<1x16x32xbf16> to vector<16x32xbf16>
    %c0_99 = arith.constant 0 : index
    %c0_100 = arith.constant 0 : index
    %c96_101 = arith.constant 96 : index
    %127 = vector.load %arg6[%c0_99, %c0_100, %c96_101] : memref<1x16x128xbf16, #tpu.memory_space<vmem>>, vector<1x16x32xbf16>
    %128 = vector.shape_cast %127 : vector<1x16x32xbf16> to vector<16x32xbf16>
    %c0_102 = arith.constant 0 : index
    %c3 = arith.constant 3 : index
    %c0_103 = arith.constant 0 : index
    %c0_104 = arith.constant 0 : index
    %129 = vector.load %arg7[%c0_102, %c3, %c0_103, %c0_104] : memref<1x4x16x16xbf16, #tpu.memory_space<vmem>>, vector<1x1x16x16xbf16>
    %130 = vector.shape_cast %129 : vector<1x1x16x16xbf16> to vector<16x16xbf16>
    %cst_105 = arith.constant dense<0.000000e+00> : vector<16x16xf32>
    %131 = tpu.matmul %124, %126, %cst_105 {dimension_numbers = #tpu.dot_dimension_numbers<[1], [1], [0], [0], [0, 0, 1, 0], [], []>} : vector<16x32xbf16>, vector<16x32xbf16>, vector<16x16xf32> -> vector<16x16xf32>
    %132 = arith.extf %130 : vector<16x16xbf16> to vector<16x16xf32>
    %133 = arith.addf %131, %132 : vector<16x16xf32>
    %c3_106 = arith.constant 3 : index
    %c0_107 = arith.constant 0 : index
    %c0_108 = arith.constant 0 : index
    %134 = vector.load %arg10[%c3_106, %c0_107, %c0_108] : memref<4x16x1xf32, #tpu.memory_space<vmem>>, vector<1x16x1xf32>
    %135 = vector.shape_cast %134 : vector<1x16x1xf32> to vector<16x1xf32>
    %cst_109 = arith.constant dense<0xFF800000> : vector<16xf32>
    %136 = vector.multi_reduction <maximumf>, %133, %cst_109 [1] : vector<16x16xf32> to vector<16xf32>
    %137 = vector.shape_cast %136 : vector<16xf32> to vector<16x1xf32>
    %138 = arith.maximumf %135, %137 : vector<16x1xf32>
    %139 = arith.subf %135, %138 : vector<16x1xf32>
    %140 = math.exp2 %139 : vector<16x1xf32>
    %141 = vector.broadcast %138 : vector<16x1xf32> to vector<16x16xf32>
    %142 = arith.subf %133, %141 : vector<16x16xf32>
    %143 = math.exp2 %142 : vector<16x16xf32>
    %c3_110 = arith.constant 3 : index
    %c0_111 = arith.constant 0 : index
    %c0_112 = arith.constant 0 : index
    %144 = vector.load %arg11[%c3_110, %c0_111, %c0_112] : memref<4x16x1xf32, #tpu.memory_space<vmem>>, vector<1x16x1xf32>
    %145 = vector.shape_cast %144 : vector<1x16x1xf32> to vector<16x1xf32>
    %146 = arith.mulf %140, %145 : vector<16x1xf32>
    %cst_113 = arith.constant dense<0.000000e+00> : vector<16xf32>
    %147 = vector.multi_reduction <add>, %143, %cst_113 [1] : vector<16x16xf32> to vector<16xf32>
    %148 = vector.shape_cast %147 : vector<16xf32> to vector<16x1xf32>
    %149 = arith.addf %146, %148 : vector<16x1xf32>
    %c3_114 = arith.constant 3 : index
    %c0_115 = arith.constant 0 : index
    %c0_116 = arith.constant 0 : index
    %150 = vector.load %arg11[%c3_114, %c0_115, %c0_116] : memref<4x16x1xf32, #tpu.memory_space<vmem>>, vector<1x16x1xf32>
    %151 = vector.shape_cast %150 : vector<1x16x1xf32> to vector<16x1xf32>
    %152 = vector.shape_cast %149 : vector<16x1xf32> to vector<1x16x1xf32>
    tpu.vector_store %arg11[%c3_114, %c0_115, %c0_116], %152 {strides = array<i32>} : memref<4x16x1xf32, #tpu.memory_space<vmem>>, vector<1x16x1xf32>,
    %c0_117 = arith.constant 0 : index
    %c96_118 = arith.constant 96 : index
    %153 = vector.load %arg9[%c0_117, %c96_118] : memref<16x128xf32, #tpu.memory_space<vmem>>, vector<16x32xf32>
    %154 = vector.broadcast %140 : vector<16x1xf32> to vector<16x32xf32>
    %155 = arith.mulf %154, %153 : vector<16x32xf32>
    %156 = arith.truncf %143 : vector<16x16xf32> to vector<16x16xbf16>
    %cst_119 = arith.constant dense<0.000000e+00> : vector<16x32xf32>
    %157 = tpu.matmul %156, %128, %cst_119 {dimension_numbers = #tpu.dot_dimension_numbers<[1], [0], [0], [1], [0, 0, 1, 1], [], []>} : vector<16x16xbf16>, vector<16x32xbf16>, vector<16x32xf32> -> vector<16x32xf32>
    %158 = arith.addf %155, %157 : vector<16x32xf32>
    %c0_120 = arith.constant 0 : index
    %c96_121 = arith.constant 96 : index
    %159 = vector.load %arg9[%c0_120, %c96_121] : memref<16x128xf32, #tpu.memory_space<vmem>>, vector<16x32xf32>
    tpu.vector_store %arg9[%c0_120, %c96_121], %158 {strides = array<i32>} : memref<16x128xf32, #tpu.memory_space<vmem>>, vector<16x32xf32>,
    %c3_122 = arith.constant 3 : index
    %c0_123 = arith.constant 0 : index
    %c0_124 = arith.constant 0 : index
    %160 = vector.load %arg10[%c3_122, %c0_123, %c0_124] : memref<4x16x1xf32, #tpu.memory_space<vmem>>, vector<1x16x1xf32>
    %161 = vector.shape_cast %160 : vector<1x16x1xf32> to vector<16x1xf32>
    %162 = vector.shape_cast %138 : vector<16x1xf32> to vector<1x16x1xf32>
    tpu.vector_store %arg10[%c3_122, %c0_123, %c0_124], %162 {strides = array<i32>} : memref<4x16x1xf32, #tpu.memory_space<vmem>>, vector<1x16x1xf32>,
    %c0_i32_125 = arith.constant 0 : i32
    %163 = arith.cmpi eq, %arg3, %c0_i32_125 : i32
    %164 = arith.extui %163 : i1 to i32
    %c0_i32_126 = arith.constant 0 : i32
    %165 = arith.cmpi ne, %164, %c0_i32_126 : i32
    scf.if %165 {
      %c0_127 = arith.constant 0 : index
      %c0_128 = arith.constant 0 : index
      %c0_129 = arith.constant 0 : index
      %166 = vector.load %arg11[%c0_127, %c0_128, %c0_129] : memref<4x16x1xf32, #tpu.memory_space<vmem>>, vector<1x16x1xf32>
      %167 = vector.shape_cast %166 : vector<1x16x1xf32> to vector<16x1xf32>
      %168 = tpu.reciprocal %167 {approx = true} : vector<16x1xf32> -> vector<16x1xf32>
      %c0_130 = arith.constant 0 : index
      %c0_131 = arith.constant 0 : index
      %169 = vector.load %arg9[%c0_130, %c0_131] : memref<16x128xf32, #tpu.memory_space<vmem>>, vector<16x32xf32>
      %170 = vector.broadcast %168 : vector<16x1xf32> to vector<16x32xf32>
      %171 = arith.mulf %169, %170 : vector<16x32xf32>
      %c0_132 = arith.constant 0 : index
      %c0_133 = arith.constant 0 : index
      %c0_134 = arith.constant 0 : index
      %172 = vector.load %arg8[%c0_132, %c0_133, %c0_134] : memref<1x16x128xf32, #tpu.memory_space<vmem>>, vector<1x16x32xf32>
      %173 = vector.shape_cast %172 : vector<1x16x32xf32> to vector<16x32xf32>
      %174 = vector.shape_cast %171 : vector<16x32xf32> to vector<1x16x32xf32>
      tpu.vector_store %arg8[%c0_132, %c0_133, %c0_134], %174 {strides = array<i32>} : memref<1x16x128xf32, #tpu.memory_space<vmem>>, vector<1x16x32xf32>,
      %c1_135 = arith.constant 1 : index
      %c0_136 = arith.constant 0 : index
      %c0_137 = arith.constant 0 : index
      %175 = vector.load %arg11[%c1_135, %c0_136, %c0_137] : memref<4x16x1xf32, #tpu.memory_space<vmem>>, vector<1x16x1xf32>
      %176 = vector.shape_cast %175 : vector<1x16x1xf32> to vector<16x1xf32>
      %177 = tpu.reciprocal %176 {approx = true} : vector<16x1xf32> -> vector<16x1xf32>
      %c0_138 = arith.constant 0 : index
      %c32_139 = arith.constant 32 : index
      %178 = vector.load %arg9[%c0_138, %c32_139] : memref<16x128xf32, #tpu.memory_space<vmem>>, vector<16x32xf32>
      %179 = vector.broadcast %177 : vector<16x1xf32> to vector<16x32xf32>
      %180 = arith.mulf %178, %179 : vector<16x32xf32>
      %c0_140 = arith.constant 0 : index
      %c0_141 = arith.constant 0 : index
      %c32_142 = arith.constant 32 : index
      %181 = vector.load %arg8[%c0_140, %c0_141, %c32_142] : memref<1x16x128xf32, #tpu.memory_space<vmem>>, vector<1x16x32xf32>
      %182 = vector.shape_cast %181 : vector<1x16x32xf32> to vector<16x32xf32>
      %183 = vector.shape_cast %180 : vector<16x32xf32> to vector<1x16x32xf32>
      tpu.vector_store %arg8[%c0_140, %c0_141, %c32_142], %183 {strides = array<i32>} : memref<1x16x128xf32, #tpu.memory_space<vmem>>, vector<1x16x32xf32>,
      %c2_143 = arith.constant 2 : index
      %c0_144 = arith.constant 0 : index
      %c0_145 = arith.constant 0 : index
      %184 = vector.load %arg11[%c2_143, %c0_144, %c0_145] : memref<4x16x1xf32, #tpu.memory_space<vmem>>, vector<1x16x1xf32>
      %185 = vector.shape_cast %184 : vector<1x16x1xf32> to vector<16x1xf32>
      %186 = tpu.reciprocal %185 {approx = true} : vector<16x1xf32> -> vector<16x1xf32>
      %c0_146 = arith.constant 0 : index
      %c64_147 = arith.constant 64 : index
      %187 = vector.load %arg9[%c0_146, %c64_147] : memref<16x128xf32, #tpu.memory_space<vmem>>, vector<16x32xf32>
      %188 = vector.broadcast %186 : vector<16x1xf32> to vector<16x32xf32>
      %189 = arith.mulf %187, %188 : vector<16x32xf32>
      %c0_148 = arith.constant 0 : index
      %c0_149 = arith.constant 0 : index
      %c64_150 = arith.constant 64 : index
      %190 = vector.load %arg8[%c0_148, %c0_149, %c64_150] : memref<1x16x128xf32, #tpu.memory_space<vmem>>, vector<1x16x32xf32>
      %191 = vector.shape_cast %190 : vector<1x16x32xf32> to vector<16x32xf32>
      %192 = vector.shape_cast %189 : vector<16x32xf32> to vector<1x16x32xf32>
      tpu.vector_store %arg8[%c0_148, %c0_149, %c64_150], %192 {strides = array<i32>} : memref<1x16x128xf32, #tpu.memory_space<vmem>>, vector<1x16x32xf32>,
      %c3_151 = arith.constant 3 : index
      %c0_152 = arith.constant 0 : index
      %c0_153 = arith.constant 0 : index
      %193 = vector.load %arg11[%c3_151, %c0_152, %c0_153] : memref<4x16x1xf32, #tpu.memory_space<vmem>>, vector<1x16x1xf32>
      %194 = vector.shape_cast %193 : vector<1x16x1xf32> to vector<16x1xf32>
      %195 = tpu.reciprocal %194 {approx = true} : vector<16x1xf32> -> vector<16x1xf32>
      %c0_154 = arith.constant 0 : index
      %c96_155 = arith.constant 96 : index
      %196 = vector.load %arg9[%c0_154, %c96_155] : memref<16x128xf32, #tpu.memory_space<vmem>>, vector<16x32xf32>
      %197 = vector.broadcast %195 : vector<16x1xf32> to vector<16x32xf32>
      %198 = arith.mulf %196, %197 : vector<16x32xf32>
      %c0_156 = arith.constant 0 : index
      %c0_157 = arith.constant 0 : index
      %c96_158 = arith.constant 96 : index
      %199 = vector.load %arg8[%c0_156, %c0_157, %c96_158] : memref<1x16x128xf32, #tpu.memory_space<vmem>>, vector<1x16x32xf32>
      %200 = vector.shape_cast %199 : vector<1x16x32xf32> to vector<16x32xf32>
      %201 = vector.shape_cast %198 : vector<16x32xf32> to vector<1x16x32xf32>
      tpu.vector_store %arg8[%c0_156, %c0_157, %c96_158], %201 {strides = array<i32>} : memref<1x16x128xf32, #tpu.memory_space<vmem>>, vector<1x16x32xf32>,
    } else {
    }
    return
  }
  func.func @transform_0(%arg0: i32, %arg1: i32, %arg2: i32, %arg3: i32) -> (i32, i32, i32) {
    %c0_i32 = arith.constant 0 : i32
    return %arg0, %arg2, %arg1 : i32, i32, i32
  }
  func.func @transform_1(%arg0: i32, %arg1: i32, %arg2: i32, %arg3: i32) -> (i32, i32, i32) {
    %c0_i32 = arith.constant 0 : i32
    return %arg0, %arg3, %arg1 : i32, i32, i32
  }
  func.func @transform_2(%arg0: i32, %arg1: i32, %arg2: i32, %arg3: i32) -> (i32, i32, i32) {
    %c0_i32 = arith.constant 0 : i32
    return %arg0, %arg3, %arg1 : i32, i32, i32
  }
  func.func @transform_3(%arg0: i32, %arg1: i32, %arg2: i32, %arg3: i32) -> (i32, i32, i32, i32) {
    %c0_i32 = arith.constant 0 : i32
    return %arg0, %arg1, %arg2, %arg3 : i32, i32, i32, i32
  }
  func.func @transform_4(%arg0: i32, %arg1: i32, %arg2: i32, %arg3: i32) -> (i32, i32, i32) {
    %c0_i32 = arith.constant 0 : i32
    return %arg0, %arg2, %arg1 : i32, i32, i32
  }
}

</mosaic_0001>

<bundles_post_ra>
// kernel: distributed_attention_local_bias_forward.1
= control target key start
LH: loop header
LB: loop body
LE: loop exit
PB: predicated region body
PF: predicated region fallthrough
CT: control target
= control target key end

     0   :  { %s1524_s15 = smov 0   ;;  %s1526_s16 = smov 0   ;;  %s1785_s0 = inlined_call_operand.vmem [shape: bf16[2,16,128], index: 0, kind: input, shape index: {}]   ;;  %s1786_s1 = inlined_call_operand.vmem [shape: bf16[2,16,128], index: 1, kind: input, shape index: {}]   ;;  %s1787_s2 = inlined_call_operand.vmem [shape: bf16[2,16,128], index: 2, kind: input, shape index: {}]   ;;  %s1788_s3 = inlined_call_operand.vmem [shape: bf16[2,4,16,16], index: 3, kind: input, shape index: {}]   ;;  %s1789_s4 = inlined_call_operand.vmem [shape: f32[2,16,128], index: 4, kind: output, shape index: {}]  }
   0x1   :  { %s1528_s17 = smov 0  }
   0x2 LB: > { %s40_s18 = sadd.s32 1, %s1487_s16  ;;  %p1277_p0 = scmp.ge.s32.totalorder %s1491_s17, 1  ;;  %s1491_s17 = sphi %s1528_s17, %s14_s17   ;;  %s1487_s16 = sphi %s1526_s16, %s1791_s16   ;;  %s1483_s15 = sphi %s1524_s15, %s1790_s15  }
   0x3   : > { %p42_p1 = scmp.ge.s32.totalorder %s40_s18, 2  ;;  %p278_p2 = scmp.lt.s32.totalorder %s1491_s17, 3 }
   0x5   : > { %s1793_s18 = smov (%p42_p1, %s40_s18), 0  ;;  %p279_p3 = pnand %p1277_p0, %p278_p2 }
   0x6   : > { %p360_p4 = scmp.lt.s32.totalorder (!%p279_p3), %s1483_s15, 1  ;;  %s1494_s26 = smov (!%p279_p3), 96  }
   0x7   : > { %282 = sbr.rel (%p279_p3) target bundleno = 1358 (0x54e), region = 36  ;;  %s1497_s5 = smov (!%p279_p3), 64  }
   0x8   : > { %s1498_s6 = smov (!%p279_p3), 32  }
   0xc   : > { %s1795_s15 = smov (!%p360_p4, %s1483_s15), 1  ;;  %vm474_vm0 = vcmask 261120   ;;  %vm435_vm1 = vcmask 7168   ;;  %v1493_v4 = vmov -1e+30   ;;  %vm497_vm2 = vcmask 130048  }
   0xd   : > { %s1545_s19 = sshll.u32 %s1795_s15, 3  ;;  %436 = vst.msk [vmem:[#allocation3] sm:$0xff] %vm435_vm1, %v1493_v4  ;;  %s1355_s27 = sshll.u32 %s1795_s15, 5  ;;  %v1495_v14 = vmov 0   ;;  %v1496_v15 = vmov 0.0   ;;  %vm722_vm3 = vcmask 523520  }
   0xe   : > { %s1551_s22 = scalar_lea.vmem %s1786_s1, %s1545_s19  ;;  %s1559_s25 = scalar_lea.vmem %s1785_s0, %s1545_s19  ;;  %437 = vst.msk [vmem:[#allocation3 + $0x8] sm:$0xff] %vm435_vm1, %v1493_v4  ;;  %1418 = vset.pattern.permute.xlu1 %v1495_v14  ;;  %1419 = vset.pattern.permute.xlu2 %v1495_v14  ;;  %vm866_vm4 = vcmask 785920   ;;  %vm1010_vm5 = vcmask 1048320  }
   0xf   : > { %v1358_v0 = vld [vmem:[%s1551_s22] sm:$0xff]  ;;  %438 = vst.msk [vmem:[#allocation3 + $0x10] sm:$0xff] %vm435_vm1, %v1493_v4  ;;  %s1577_s30 = scalar_lea.vmem %s1788_s3, %s1355_s27  ;;  %1420 = vset.pattern.permute.xlu0 %v1495_v14  ;;  %s1619_s9 = scalar_lea.vmem %s1787_s2, %s1545_s19 }
  0x10   : > { %v479_v1 = vsel %vm474_vm0, %v1358_v0, 0  ;;  %v1357_v2 = vld [vmem:[%s1559_s25] sm:$0xff]  ;;  %439 = vst.msk [vmem:[#allocation3 + $0x18] sm:$0xff] %vm435_vm1, %v1493_v4  ;;  %v1385_v46 = vld [vmem:[%s1577_s30 + $0x8] sm:$0xff]   ;;  %v1387_v51 = vld [vmem:[%s1577_s30 + $0x18] sm:$0xff]   ;;  %s1356_s10 = sshll.u32 %s1795_s15, 4 }
  0x11   : > { %488 = vmatpush.bf16.xpose.msra.mxu0 %v479_v1  ;;  %v1361_v3 = vld [vmem:[%s1551_s22] sm:$0xff]  ;;  %440 = vst.msk [vmem:[#allocation3 + $0x20] sm:$0xff] %vm435_vm1, %v1493_v4  ;;  %v1375_v47 = vunpack.c.l.bf16 %v1385_v46  ;;  %v1383_v52 = vunpack.c.l.bf16 %v1387_v51  ;;  %v1376_v55 = vunpack.c.h.bf16 %v1385_v46  ;;  %v1384_v59 = vunpack.c.h.bf16 %v1387_v51  ;;  %s428_s13 = scalar_lea.vmem %s1789_s4, %s1356_s10 }
  0x12   : > { %606 = vrot.lane.b32.xlu1 %v1361_v3, %s1494_s26  ;;  %441 = vst.msk [vmem:[#allocation3 + $0x28] sm:$0xff] %vm435_vm1, %v1493_v4  ;;  %v1370_v5 = vld [vmem:[%s1577_s30] sm:$0xff]  }
  0x13   : > { %442 = vst.msk [vmem:[#allocation3 + $0x30] sm:$0xff] %vm435_vm1, %v1493_v4  ;;  %v1371_v6 = vunpack.c.l.bf16 %v1370_v5  ;;  %v1372_v10 = vunpack.c.h.bf16 %v1370_v5  ;;  %v1364_v16 = vld [vmem:[%s1551_s22] sm:$0xff] }
  0x14   : > { %443 = vst.msk [vmem:[#allocation3 + $0x38] sm:$0xff] %vm435_vm1, %v1493_v4  ;;  %v495_v17 = vld [vmem:[#allocation3] sm:$0xff]  ;;  %v1363_v22 = vld [vmem:[%s1559_s25] sm:$0xff] }
  0x15   : > { %452 = vst [vmem:[#allocation2] sm:$0xff] %v1496_v15  ;;  %v1596_v21 = vld [vmem:[#allocation3 + $0x8] sm:$0xff]  ;;  %v1366_v26 = vld [vmem:[%s1559_s25] sm:$0xff]  ;;  %v1386_v4 = vld [vmem:[%s1577_s30 + $0x10] sm:$0xff]  }
  0x16   : > { %444 = vst.msk [vmem:[#allocation4] sm:$0xff] %vm435_vm1, %v1496_v15  ;;  %v1360_v27 = vld [vmem:[%s1559_s25] sm:$0xff]  ;;  %v1379_v5 = vunpack.c.l.bf16 %v1386_v4 }
  0x17   : > { %445 = vst.msk [vmem:[#allocation4 + $0x8] sm:$0xff] %vm435_vm1, %v1496_v15  ;;  %v1367_v28 = vld [vmem:[%s1551_s22] sm:$0xff] }
  0x18   : > { %1296 = vmatmul.msk.bf16.vlgmr.msra.gmra.mxu0 %vm474_vm0, %v1357_v2  ;;  %446 = vst.msk [vmem:[#allocation4 + $0x10] sm:$0xff] %vm435_vm1, %v1496_v15  ;;  %v1359_v31 = vld [vmem:[%s1619_s9] sm:$0xff] }
  0x19   : > { %447 = vst.msk [vmem:[#allocation4 + $0x18] sm:$0xff] %vm435_vm1, %v1496_v15  ;;  %570 = vmatpush.bf16.msra.mxu1 %v1359_v31  ;;  %v1365_v14 = vld [vmem:[%s1619_s9] sm:$0xff] }
  0x1a   : > { %448 = vst.msk [vmem:[#allocation4 + $0x20] sm:$0xff] %vm435_vm1, %v1496_v15 }
  0x1b   : > { %449 = vst.msk [vmem:[#allocation4 + $0x28] sm:$0xff] %vm435_vm1, %v1496_v15 }
  0x1c   : > { %450 = vst.msk [vmem:[#allocation4 + $0x30] sm:$0xff] %vm435_vm1, %v1496_v15 }
  0x1d   : > { %451 = vst.msk [vmem:[#allocation4 + $0x38] sm:$0xff] %vm435_vm1, %v1496_v15 }
  0x1e   : > { %453 = vst [vmem:[#allocation2 + $0x8] sm:$0xff] %v1496_v15  ;;  %v1670_v15 = vld [vmem:[#allocation3 + $0x30] sm:$0xff] }
  0x84   : > { %v607_v29 = vpop.permute.xlu1 %606 }
  0x85   : > { %v612_v30 = vsel %vm474_vm0, %v607_v29, 0 }
  0x86   : > { %621 = vmatpush.bf16.xpose.msra.mxu2 %v612_v30 }
  0x95   : > { %v490_v7 = vpop.f32.mrf.mxu0 }
  0x96   : > { %v1580_v8 = vadd.f32 %v1371_v6, %v490_v7 }
  0x98   : > { %v498_v9 = vsel %vm497_vm2, %v1580_v8, -inf }
  0x99   : > { %499 = vmax.xlane.f32.xlu0 %v498_v9 }
  0x9d   : > { %v492_v11 = vpop.f32.mrf.mxu0 }
  0x9e   : > { %v493_v12 = vadd.f32 %v1372_v10, %v492_v11  ;;  %v629_v10 = vld [vmem:[#allocation3 + $0x10] sm:$0xff] }
  0xa0   : > { %v501_v13 = vsel %vm497_vm2, %v493_v12, -inf }
  0xa1   : > { %502 = vmax.xlane.f32.xlu0 %v501_v13  ;;  %v1362_v13 = vld [vmem:[%s1619_s9] sm:$0xff] }
  0xb5   : > { %750 = vrot.lane.b32.xlu0 %v1364_v16, %s1497_s5 }
 0x10c   : > { %v500_v18 = vpop.xlane.xlu0 %499 }
 0x10d   : > { %v504_v19 = vmax.f32 %v495_v17, %v500_v18 }
 0x10f   : > { %v506_v20 = vsub.f32 %v495_v17, %v504_v19  ;;  %581 = vst.msk [vmem:[#allocation3] sm:$0xff] %vm435_vm1, %v504_v19  ;;  %512 = vperm.xlu1 %1418, %v504_v19  }
 0x114   : > { %v503_v23 = vpop.xlane.xlu0 %502 }
 0x115   : > { %v1600_v24 = vmax.f32 %v1596_v21, %v503_v23  ;;  %v630_v23 = vld [vmem:[#allocation3 + $0x18] sm:$0xff] }
 0x117   : > { %v507_v25 = vsub.f32 %v1596_v21, %v1600_v24  ;;  %582 = vst.msk [vmem:[#allocation3 + $0x8] sm:$0xff] %vm435_vm1, %v1600_v24  ;;  %743 = vrot.lane.b32.xlu1 %v1363_v22, %s1497_s5  ;;  %517 = vperm.xlu2 %1419, %v1600_v24   ;;  %v1680_v24 = vld [vmem:[#allocation3 + $0x38] sm:$0xff] }
 0x11f   : > { %887 = vrot.lane.b32.xlu1 %v1366_v26, %s1498_s6  ;;  %599 = vrot.lane.b32.xlu2 %v1360_v27, %s1494_s26 }
 0x127   : > { %894 = vrot.lane.b32.xlu2 %v1367_v28, %s1498_s6  ;;  %v751_v34 = vpop.permute.xlu0 %750 }
 0x128   : > { %v756_v35 = vsel %vm474_vm0, %v751_v34, 0 }
 0x129   : > { %765 = vmatpush.bf16.xpose.msrb.mxu1 %v756_v35  ;;  %v1380_v35 = vunpack.c.h.bf16 %v1386_v4 }
 0x171   : > { %v518_v32 = vpop.permute.xlu2 %517 }
 0x172   : > { %v521_v36 = vsub.f32 %v493_v12, %v518_v32 }
 0x174   : > { %1421 = vpow2.f32 %v521_v36 }
 0x179   : > { %v600_v33 = vpop.permute.xlu2 %599 }
 0x17a   : > { %1312 = vmatmul.msk.bf16.vlgmr.msra.gmra.mxu2 %vm474_vm0, %v600_v33  ;;  %v1626_v41 = vpop.eup %1421 }
 0x17b   : > { %v531_v36 = vsel %vm497_vm2, %v1626_v41, 0.0 }
 0x181   : > { %v513_v37 = vpop.permute.xlu1 %512  ;;  %v895_v38 = vpop.permute.xlu2 %894 }
 0x182   : > { %v520_v39 = vsub.f32 %v1580_v8, %v513_v37  ;;  %v900_v40 = vsel %vm474_vm0, %v895_v38, 0 }
 0x183   : > { %909 = vmatpush.bf16.xpose.msrb.mxu0 %v900_v40  ;;  %v524_v40 = vld [vmem:[#allocation4] sm:$0xff] }
 0x184   : > { %1423 = vpow2.f32 %v520_v39 }
 0x185   : > { %1425 = vpow2.f32 %v506_v20  ;;  %v1368_v20 = vld [vmem:[%s1619_s9] sm:$0xff] }
 0x186   : > { %1427 = vpow2.f32 %v507_v25 }
 0x189   : > { %v744_v42 = vpop.permute.xlu1 %743 }
 0x18a   : > { %v1424_v43 = vpop.eup %1423 }
 0x18b   : > { %v553_v44 = vpack.c.bf16 %v1626_v41, %v1424_v43  ;;  %v1642_v58 = vpop.eup %1425  ;;  %v528_v6 = vsel %vm497_vm2, %v1424_v43, 0.0 }
 0x18c   : > { %v1656_v1 = vpop.eup %1427 }
 0x18d   : > { %1301 = vmatmul.msk.bf16.vlgmr.msra.gmra.mxu1 %vm497_vm2, %v553_v44 }
 0x191   : > { %v888_v45 = vpop.permute.xlu1 %887 }
 0x192   : > { %1344 = vmatmul.msk.bf16.vlgmr.msrb.gmra.mxu0 %vm474_vm0, %v888_v45  ;;  %v773_v45 = vld [vmem:[#allocation3 + $0x20] sm:$0xff] }
 0x19d   : > { %1328 = vmatmul.msk.bf16.vlgmr.msrb.gmra.mxu1 %vm474_vm0, %v744_v42  ;;  %v526_v42 = vmul.f32 %v1642_v58, %v524_v40 }
 0x1fd   : > { %v623_v48 = vpop.f32.mrf.mxu2 }
 0x1fe   : > { %v1633_v49 = vadd.f32 %v1375_v47, %v623_v48 }
 0x200   : > { %v631_v50 = vsel %vm497_vm2, %v1633_v49, -inf }
 0x201   : > { %632 = vmax.xlane.f32.xlu0 %v631_v50 }
 0x205   : > { %v625_v57 = vpop.f32.mrf.mxu2 }
 0x206   : > { %v1645_v60 = vadd.f32 %v1376_v55, %v625_v57 }
 0x208   : > { %v634_v63 = vsel %vm497_vm2, %v1645_v60, -inf }
 0x20a   : > { %v572_v2 = vpop.f32.mrf.mxu1 }
 0x20f   : > { %v911_v53 = vpop.f32.mrf.mxu0 }
 0x210   : > { %v1638_v54 = vadd.f32 %v1383_v52, %v911_v53 }
 0x212   : > { %v919_v56 = vsel %vm497_vm2, %v1638_v54, -inf  ;;  %v574_v3 = vpop.f32.mrf.mxu1 }
 0x213   : > { %920 = vmax.xlane.f32.xlu2 %v919_v56 }
 0x215   : > { %543 = vperm.xlu0 %1420, %v1642_v58  }
 0x217   : > { %v913_v61 = vpop.f32.mrf.mxu0 }
 0x218   : > { %v1647_v62 = vadd.f32 %v1384_v59, %v913_v61 }
 0x21a   : > { %v922_v0 = vsel %vm497_vm2, %v1647_v62, -inf  ;;  %v767_v7 = vpop.f32.mrf.mxu1 }
 0x21b   : > { %635 = vmax.xlane.f32.xlu2 %v634_v63  ;;  %923 = vmax.xlane.f32.xlu1 %v922_v0  ;;  %v1661_v8 = vadd.f32 %v1379_v5, %v767_v7  ;;  %v525_v63 = vld [vmem:[#allocation4 + $0x8] sm:$0xff] }
 0x21c   : > { %v527_v0 = vmul.f32 %v1656_v1, %v525_v63 }
 0x21d   : > { %v775_v9 = vsel %vm497_vm2, %v1661_v8, -inf }
 0x222   : > { %v769_v37 = vpop.f32.mrf.mxu1 }
 0x223   : > { %v1697_v38 = vadd.f32 %v1380_v35, %v769_v37 }
 0x225   : > { %v778_v39 = vsel %vm497_vm2, %v1697_v38, -inf }
 0x233   : > { %548 = vperm.xlu2 %1419, %v1656_v1  }
 0x25c   : > { %529 = vadd.xlane.f32.xlu2 %v528_v6 }
 0x264   : > { %776 = vmax.xlane.f32.xlu2 %v775_v9 }
 0x274   : > { %v633_v11 = vpop.xlane.xlu0 %632 }
 0x275   : > { %v637_v12 = vmax.f32 %v629_v10, %v633_v11  ;;  %v658_v11 = vld [vmem:[#allocation4 + $0x10] sm:$0xff] }
 0x277   : > { %725 = vst.msk [vmem:[#allocation3 + $0x10] sm:$0xff] %vm435_vm1, %v637_v12  ;;  %645 = vperm.xlu1 %1418, %v637_v12   ;;  %v639_v21 = vsub.f32 %v629_v10, %v637_v12 }
 0x279   : > { %1429 = vpow2.f32 %v639_v21 }
 0x27c   : > { %692 = vrot.lane.b32.xlu2 %v1362_v13, %s1494_s26 }
 0x27f   : > { %v1688_v30 = vpop.eup %1429 }
 0x280   : > { %v660_v12 = vmul.f32 %v1688_v30, %v658_v11 }
 0x284   : > { %836 = vrot.lane.b32.xlu2 %v1365_v14, %s1497_s5 }
 0x286   : > { %v921_v16 = vpop.xlane.xlu2 %920 }
 0x287   : > { %v1673_v17 = vmax.f32 %v1670_v15, %v921_v16  ;;  %v544_v18 = vpop.permute.xlu0 %543 }
 0x288   : > { %v551_v19 = vmul.f32 0.0, %v544_v18 }
 0x289   : > { %1013 = vst.msk [vmem:[#allocation3 + $0x30] sm:$0xff] %vm435_vm1, %v1673_v17  ;;  %v927_v37 = vsub.f32 %v1670_v15, %v1673_v17 }
 0x28a   : > { %v577_v22 = vadd.f32 %v572_v2, %v551_v19 }
 0x28c   : > { %579 = vst.msk [vmem:[#allocation2] sm:$0xff] %vm474_vm0, %v577_v22  ;;  %980 = vrot.lane.b32.xlu2 %v1368_v20, %s1498_s6 }
 0x28e   : > { %v636_v25 = vpop.xlane.xlu2 %635  ;;  %v924_v26 = vpop.xlane.xlu1 %923 }
 0x28f   : > { %v638_v27 = vmax.f32 %v630_v23, %v636_v25  ;;  %v1683_v28 = vmax.f32 %v1680_v24, %v924_v26 }
 0x291   : > { %v640_v29 = vsub.f32 %v630_v23, %v638_v27  ;;  %726 = vst.msk [vmem:[#allocation3 + $0x18] sm:$0xff] %vm435_vm1, %v638_v27  ;;  %650 = vperm.xlu0 %1420, %v638_v27  }
 0x292   : > { %1014 = vst.msk [vmem:[#allocation3 + $0x38] sm:$0xff] %vm435_vm1, %v1683_v28 }
 0x293   : > { %1431 = vpow2.f32 %v640_v29 }
 0x294   : > { %676 = vperm.xlu2 %1419, %v1688_v30  }
 0x296   : > { %v549_v31 = vpop.permute.xlu2 %548 }
 0x297   : > { %v552_v32 = vmul.f32 0.0, %v549_v31 }
 0x299   : > { %v578_v33 = vadd.f32 %v574_v3, %v552_v32  ;;  %v1691_v34 = vpop.eup %1431 }
 0x29b   : > { %580 = vst.msk [vmem:[#allocation2 + $0x8] sm:$0xff] %vm474_vm0, %v578_v33 }
 0x29c   : > { %681 = vperm.xlu2 %1419, %v1691_v34  }
 0x2a1   : > { %532 = vadd.xlane.f32.xlu1 %v531_v36 }
 0x2a9   : > { %779 = vmax.xlane.f32.xlu1 %v778_v39 }
 0x2cf   : > { %v530_v43 = vpop.xlane.xlu2 %529 }
 0x2d0   : > { %v534_v44 = vadd.f32 %v530_v43, %v526_v42  ;;  %v672_v43 = vld [vmem:[#allocation2] sm:$0xff] }
 0x2d2   : > { %537 = vst.msk [vmem:[#allocation4] sm:$0xff] %vm435_vm1, %v534_v44 }
 0x2d7   : > { %v777_v46 = vpop.xlane.xlu2 %776 }
 0x2d8   : > { %v781_v47 = vmax.f32 %v773_v45, %v777_v46 }
 0x2da   : > { %v783_v48 = vsub.f32 %v773_v45, %v781_v47  ;;  %869 = vst.msk [vmem:[#allocation3 + $0x20] sm:$0xff] %vm435_vm1, %v781_v47  ;;  %789 = vperm.xlu0 %1420, %v781_v47  }
 0x2df   : > { %v693_v41 = vpop.permute.xlu2 %692 }
 0x2e0   : > { %705 = vmatpush.bf16.msra.mxu3 %v693_v41 }
 0x2e2   : > { %933 = vperm.xlu0 %1420, %v1673_v17   ;;  %v673_v17 = vld [vmem:[#allocation2 + $0x8] sm:$0xff] }
 0x2e7   : > { %v837_v50 = vpop.permute.xlu2 %836 }
 0x2e8   : > { %849 = vmatpush.bf16.msrb.mxu3 %v837_v50 }
 0x2e9   : > { %v646_v52 = vpop.permute.xlu1 %645 }
 0x2ea   : > { %v653_v53 = vsub.f32 %v1633_v49, %v646_v52  ;;  %v774_v49 = vld [vmem:[#allocation3 + $0x28] sm:$0xff] }
 0x2ec   : > { %1433 = vpow2.f32 %v653_v53 }
 0x2ef   : > { %v981_v51 = vpop.permute.xlu2 %980 }
 0x2f0   : > { %993 = vmatpush.bf16.msrb.mxu2 %v981_v51 }
 0x2f2   : > { %v1434_v57 = vpop.eup %1433 }
 0x2f3   : > { %v662_v58 = vsel %vm497_vm2, %v1434_v57, 0.0 }
 0x2f7   : > { %v677_v40 = vpop.permute.xlu2 %676 }
 0x2f8   : > { %v684_v44 = vmul.f32 %v677_v40, %v672_v43 }
 0x2ff   : > { %v682_v42 = vpop.permute.xlu2 %681 }
 0x303   : > { %v651_v55 = vpop.permute.xlu0 %650 }
 0x304   : > { %v654_v56 = vsub.f32 %v1645_v60, %v651_v55 }
 0x306   : > { %1435 = vpow2.f32 %v654_v56 }
 0x30c   : > { %v1436_v59 = vpop.eup %1435  ;;  %663 = vadd.xlane.f32.xlu0 %v662_v58 }
 0x30d   : > { %v686_v61 = vpack.c.bf16 %v1436_v59, %v1434_v57  ;;  %v665_v1 = vsel %vm497_vm2, %v1436_v59, 0.0  ;;  %v802_v59 = vld [vmem:[#allocation4 + $0x20] sm:$0xff] }
 0x30f   : > { %1317 = vmatmul.msk.bf16.vlgmr.msra.gmra.mxu3 %vm497_vm2, %v686_v61 }
 0x314   : > { %v533_v2 = vpop.xlane.xlu1 %532 }
 0x315   : > { %v535_v3 = vadd.f32 %v533_v2, %v527_v0 }
 0x317   : > { %538 = vst.msk [vmem:[#allocation4 + $0x8] sm:$0xff] %vm435_vm1, %v535_v3 }
 0x31c   : > { %v780_v4 = vpop.xlane.xlu1 %779 }
 0x31d   : > { %v782_v5 = vmax.f32 %v774_v49, %v780_v4 }
 0x31e   : > { %v1019_v53 = vld [vmem:[#allocation4 + $0x8] sm:$0xff] }
 0x31f   : > { %v784_v60 = vsub.f32 %v774_v49, %v782_v5  ;;  %870 = vst.msk [vmem:[#allocation3 + $0x28] sm:$0xff] %vm435_vm1, %v782_v5  ;;  %794 = vperm.xlu1 %1418, %v782_v5  }
 0x321   : > { %1437 = vpow2.f32 %v784_v60  ;;  %v1018_v60 = vld [vmem:[#allocation4] sm:$0xff] }
 0x322   : > { %1439 = vpow2.f32 %v783_v48  ;;  %v803_v48 = vld [vmem:[#allocation4 + $0x28] sm:$0xff] }
 0x327   : > { %v1712_v6 = vpop.eup %1437  ;;  %938 = vperm.xlu1 %1418, %v1683_v28  }
 0x328   : > { %825 = vperm.xlu0 %1420, %v1712_v6   ;;  %v1717_v7 = vpop.eup %1439  ;;  %v805_v41 = vmul.f32 %v1712_v6, %v803_v48 }
 0x329   : > { %v804_v61 = vmul.f32 %v1717_v7, %v802_v59 }
 0x34c   : > { %v790_v9 = vpop.permute.xlu0 %789 }
 0x34d   : > { %v797_v16 = vsub.f32 %v1661_v8, %v790_v9 }
 0x34f   : > { %1441 = vpow2.f32 %v797_v16 }
 0x351   : > { %666 = vadd.xlane.f32.xlu1 %v665_v1 }
 0x354   : > { %v934_v10 = vpop.permute.xlu0 %933 }
 0x355   : > { %v941_v21 = vsub.f32 %v1638_v54, %v934_v10  ;;  %v1442_v22 = vpop.eup %1441  ;;  %v659_v54 = vld [vmem:[#allocation4 + $0x18] sm:$0xff] }
 0x356   : > { %v661_v33 = vmul.f32 %v1691_v34, %v659_v54 }
 0x36a   : > { %820 = vperm.xlu1 %1418, %v1717_v7  }
 0x37f   : > { %v664_v13 = vpop.xlane.xlu0 %663 }
 0x380   : > { %v668_v14 = vadd.f32 %v664_v13, %v660_v12 }
 0x382   : > { %670 = vst.msk [vmem:[#allocation4 + $0x10] sm:$0xff] %vm435_vm1, %v668_v14 }
 0x389   : > { %v1038_v57 = vld [vmem:[#allocation4 + $0x10] sm:$0xff] }
 0x391   : > { %v795_v18 = vpop.permute.xlu1 %794 }
 0x392   : > { %v798_v19 = vsub.f32 %v1697_v38, %v795_v18  ;;  %v707_v20 = vpop.f32.mrf.mxu3  ;;  %v928_v38 = vsub.f32 %v1680_v24, %v1683_v28  ;;  %v685_v24 = vmul.f32 %v682_v42, %v673_v17 }
 0x393   : > { %714 = vrot.lane.b32.xlu2 %v707_v20, %s1498_s6 }
 0x394   : > { %1443 = vpow2.f32 %v798_v19 }
 0x395   : > { %1445 = vpow2.f32 %v941_v21 }
 0x399   : > { %v939_v23 = vpop.permute.xlu1 %938 }
 0x39a   : > { %v1444_v25 = vpop.eup %1443  ;;  %v942_v26 = vsub.f32 %v1647_v62, %v939_v23  ;;  %v709_v27 = vpop.f32.mrf.mxu3  ;;  %v806_v62 = vsel %vm497_vm2, %v1442_v22, 0.0 }
 0x39b   : > { %716 = vrot.lane.b32.xlu2 %v709_v27, %s1498_s6  ;;  %v809_v8 = vsel %vm497_vm2, %v1444_v25, 0.0  ;;  %v830_v29 = vpack.c.bf16 %v1444_v25, %v1442_v22  ;;  %v1446_v30 = vpop.eup %1445  ;;  %v826_v47 = vpop.permute.xlu0 %825 }
 0x39c   : > { %1447 = vpow2.f32 %v942_v26  ;;  %810 = vadd.xlane.f32.xlu0 %v809_v8  ;;  %v950_v4 = vsel %vm497_vm2, %v1446_v30, 0.0 }
 0x39d   : > { %1333 = vmatmul.msk.bf16.vlgmr.msrb.gmra.mxu3 %vm497_vm2, %v830_v29  ;;  %1449 = vpow2.f32 %v927_v37 }
 0x39e   : > { %1451 = vpow2.f32 %v928_v38 }
 0x39f   : > { %1453 = vrcp.f32 %v1019_v53 }
 0x3a0   : > { %1455 = vrcp.f32 %v1038_v57 }
 0x3a2   : > { %v1448_v31 = vpop.eup %1447 }
 0x3a3   : > { %v974_v32 = vpack.c.bf16 %v1448_v31, %v1446_v30  ;;  %v1738_v39 = vpop.eup %1449  ;;  %v953_v5 = vsel %vm497_vm2, %v1448_v31, 0.0  ;;  %v946_v30 = vld [vmem:[#allocation4 + $0x30] sm:$0xff] }
 0x3a4   : > { %v1741_v34 = vpop.eup %1451  ;;  %v948_v31 = vmul.f32 %v1738_v39, %v946_v30 }
 0x3a5   : > { %1349 = vmatmul.msk.bf16.vlgmr.msrb.gmra.mxu2 %vm497_vm2, %v974_v32  ;;  %v1454_v58 = vpop.eup %1453 }
 0x3a6   : > { %v1456_v2 = vpop.eup %1455 }
 0x3c4   : > { %v667_v35 = vpop.xlane.xlu1 %666  ;;  %807 = vadd.xlane.f32.xlu2 %v806_v62 }
 0x3c5   : > { %v669_v36 = vadd.f32 %v667_v35, %v661_v33  ;;  %v947_v33 = vld [vmem:[#allocation4 + $0x38] sm:$0xff] }
 0x3c6   : > { %v949_v62 = vmul.f32 %v1741_v34, %v947_v33 }
 0x3c7   : > { %671 = vst.msk [vmem:[#allocation4 + $0x18] sm:$0xff] %vm435_vm1, %v669_v36 }
 0x3ce   : > { %v1039_v0 = vld [vmem:[#allocation4 + $0x18] sm:$0xff] }
 0x3cf   : > { %1457 = vrcp.f32 %v1039_v0 }
 0x3d0   : > { %1459 = vrcp.f32 %v1018_v60 }
 0x3d5   : > { %v1458_v49 = vpop.eup %1457 }
 0x3d6   : > { %v1460_v9 = vpop.eup %1459 }
 0x3dc   : > { %964 = vperm.xlu2 %1419, %v1738_v39   ;;  %v821_v12 = vpop.permute.xlu1 %820 }
 0x3e4   : > { %969 = vperm.xlu2 %1419, %v1741_v34  }
 0x3ed   : > { %v715_v45 = vpop.permute.xlu2 %714 }
 0x3ee   : > { %v720_v15 = vadd.f32 %v715_v45, %v684_v44 }
 0x3f0   : > { %723 = vst.msk [vmem:[#allocation2] sm:$0xff] %vm722_vm3, %v720_v15 }
 0x3f5   : > { %v717_v28 = vpop.permute.xlu2 %716 }
 0x3f6   : > { %v721_v46 = vadd.f32 %v717_v28, %v685_v24 }
 0x3f7   : > { %v816_v14 = vld [vmem:[#allocation2] sm:$0xff] }
 0x3f8   : > { %724 = vst.msk [vmem:[#allocation2 + $0x8] sm:$0xff] %vm722_vm3, %v721_v46  ;;  %v828_v16 = vmul.f32 %v821_v12, %v816_v14 }
 0x3ff   : > { %v817_v21 = vld [vmem:[#allocation2 + $0x8] sm:$0xff] }
 0x400   : > { %v829_v22 = vmul.f32 %v826_v47, %v817_v21 }
 0x40f   : > { %v811_v50 = vpop.xlane.xlu0 %810 }
 0x410   : > { %v813_v51 = vadd.f32 %v811_v50, %v805_v41 }
 0x412   : > { %815 = vst.msk [vmem:[#allocation4 + $0x28] sm:$0xff] %vm435_vm1, %v813_v51 }
 0x419   : > { %v1059_v6 = vld [vmem:[#allocation4 + $0x28] sm:$0xff] }
 0x41a   : > { %1461 = vrcp.f32 %v1059_v6 }
 0x420   : > { %v851_v52 = vpop.f32.mrf.mxu3  ;;  %v1462_v10 = vpop.eup %1461 }
 0x421   : > { %858 = vrot.lane.b32.xlu1 %v851_v52, %s1497_s5 }
 0x428   : > { %v853_v55 = vpop.f32.mrf.mxu3  ;;  %v995_v56 = vpop.f32.mrf.mxu2 }
 0x429   : > { %860 = vrot.lane.b32.xlu0 %v853_v55, %s1497_s5  ;;  %1002 = vrot.lane.b32.xlu2 %v995_v56, %s1494_s26 }
 0x430   : > { %v997_v1 = vpop.f32.mrf.mxu2 }
 0x431   : > { %1031 = vperm.xlu2 %1419, %v1454_v58  }
 0x437   : > { %v808_v63 = vpop.xlane.xlu2 %807 }
 0x438   : > { %v812_v3 = vadd.f32 %v808_v63, %v804_v61 }
 0x439   : > { %1046 = vperm.xlu2 %1419, %v1456_v2  }
 0x43a   : > { %814 = vst.msk [vmem:[#allocation4 + $0x20] sm:$0xff] %vm435_vm1, %v812_v3 }
 0x43f   : > { %v965_v13 = vpop.permute.xlu2 %964 }
 0x441   : > { %1051 = vperm.xlu2 %1419, %v1458_v49   ;;  %v1058_v7 = vld [vmem:[#allocation4 + $0x20] sm:$0xff] }
 0x442   : > { %1463 = vrcp.f32 %v1058_v7 }
 0x447   : > { %v970_v20 = vpop.permute.xlu2 %969 }
 0x448   : > { %v1464_v11 = vpop.eup %1463 }
 0x44b   : > { %951 = vadd.xlane.f32.xlu1 %v950_v4 }
 0x453   : > { %954 = vadd.xlane.f32.xlu0 %v953_v5 }
 0x464   : > { %1004 = vrot.lane.b32.xlu1 %v997_v1, %s1494_s26 }
 0x467   : > { %1026 = vperm.xlu0 %1420, %v1460_v9  }
 0x46c   : > { %1071 = vperm.xlu1 %1418, %v1462_v10  }
 0x46f   : > { %1066 = vperm.xlu0 %1420, %v1464_v11  }
 0x483   : > { %v1003_v8 = vpop.permute.xlu2 %1002 }
 0x48b   : > { %v1032_v38 = vpop.permute.xlu2 %1031 }
 0x493   : > { %v859_v18 = vpop.permute.xlu1 %858  ;;  %v1047_v44 = vpop.permute.xlu2 %1046 }
 0x494   : > { %v864_v19 = vadd.f32 %v859_v18, %v828_v16 }
 0x496   : > { %867 = vst.msk [vmem:[#allocation2] sm:$0xff] %vm866_vm4, %v864_v19 }
 0x49b   : > { %v861_v23 = vpop.permute.xlu0 %860  ;;  %v1052_v47 = vpop.permute.xlu2 %1051 }
 0x49c   : > { %v865_v25 = vadd.f32 %v861_v23, %v829_v22 }
 0x49d   : > { %v960_v26 = vld [vmem:[#allocation2] sm:$0xff] }
 0x49e   : > { %v972_v27 = vmul.f32 %v965_v13, %v960_v26  ;;  %868 = vst.msk [vmem:[#allocation2 + $0x8] sm:$0xff] %vm866_vm4, %v865_v25 }
 0x4a0   : > { %v1008_v29 = vadd.f32 %v1003_v8, %v972_v27 }
 0x4a2   : > { %1011 = vst.msk [vmem:[#allocation2] sm:$0xff] %vm1010_vm5, %v1008_v29 }
 0x4a5   : > { %v961_v39 = vld [vmem:[#allocation2 + $0x8] sm:$0xff] }
 0x4a6   : > { %v973_v43 = vmul.f32 %v970_v20, %v961_v39 }
 0x4a9   : > { %v1042_v24 = vld [vmem:[#allocation2] sm:$0xff] }
 0x4aa   : > { %v1054_v46 = vmul.f32 %v1047_v44, %v1042_v24 }
 0x4be   : > { %v952_v32 = vpop.xlane.xlu1 %951 }
 0x4bf   : > { %v956_v54 = vadd.f32 %v952_v32, %v948_v31 }
 0x4c1   : > { %958 = vst.msk [vmem:[#allocation4 + $0x30] sm:$0xff] %vm435_vm1, %v956_v54 }
 0x4c6   : > { %v955_v35 = vpop.xlane.xlu0 %954 }
 0x4c7   : > { %v957_v36 = vadd.f32 %v955_v35, %v949_v62 }
 0x4c8   : > { %v1078_v37 = vld [vmem:[#allocation4 + $0x30] sm:$0xff] }
 0x4c9   : > { %959 = vst.msk [vmem:[#allocation4 + $0x38] sm:$0xff] %vm435_vm1, %v957_v36  ;;  %1465 = vrcp.f32 %v1078_v37 }
 0x4cf   : > { %v1466_v40 = vpop.eup %1465 }
 0x4d0   : > { %1086 = vperm.xlu2 %1419, %v1466_v40   ;;  %v1079_v42 = vld [vmem:[#allocation4 + $0x38] sm:$0xff] }
 0x4d1   : > { %1467 = vrcp.f32 %v1079_v42 }
 0x4d6   : > { %v1005_v45 = vpop.permute.xlu1 %1004 }
 0x4d7   : > { %v1468_v15 = vpop.eup %1467  ;;  %v1009_v17 = vadd.f32 %v1005_v45, %v973_v43 }
 0x4d8   : > { %1091 = vperm.xlu0 %1420, %v1468_v15  }
 0x4d9   : > { %1012 = vst.msk [vmem:[#allocation2 + $0x8] sm:$0xff] %vm1010_vm5, %v1009_v17  ;;  %v1027_v34 = vpop.permute.xlu0 %1026 }
 0x4da   : > { %v1034_v28 = vmul.f32 %v1042_v24, %v1027_v34 }
 0x4dc   : > { %1036 = vst.msk [vmem:[%s428_s13] sm:$0xff] %vm474_vm0, %v1034_v28 }
 0x4dd   : > { %1056 = vst.msk [vmem:[%s428_s13] sm:$0xff] %vm722_vm3, %v1054_v46 }
 0x4de   : > { %v1072_v52 = vpop.permute.xlu1 %1071 }
 0x4e0   : > { %v1023_v48 = vld [vmem:[#allocation2 + $0x8] sm:$0xff] }
 0x4e1   : > { %v1035_v41 = vmul.f32 %v1032_v38, %v1023_v48  ;;  %v1055_v50 = vmul.f32 %v1052_v47, %v1023_v48  ;;  %v1067_v51 = vpop.permute.xlu0 %1066  ;;  %v1075_v55 = vmul.f32 %v1072_v52, %v1023_v48 }
 0x4e2   : > { %v1074_v53 = vmul.f32 %v1067_v51, %v1042_v24 }
 0x4e3   : > { %1037 = vst.msk [vmem:[%s428_s13 + $0x8] sm:$0xff] %vm474_vm0, %v1035_v41 }
 0x4e4   : > { %1057 = vst.msk [vmem:[%s428_s13 + $0x8] sm:$0xff] %vm722_vm3, %v1055_v50 }
 0x4e5   : > { %1077 = vst.msk [vmem:[%s428_s13 + $0x8] sm:$0xff] %vm866_vm4, %v1075_v55 }
 0x4e6   : > { %1076 = vst.msk [vmem:[%s428_s13] sm:$0xff] %vm866_vm4, %v1074_v53 }
 0x52a   : > { %v1087_v56 = vpop.permute.xlu2 %1086 }
 0x52b   : > { %v1094_v57 = vmul.f32 %v1087_v56, %v1042_v24 }
 0x52d   : > { %1096 = vst.msk [vmem:[%s428_s13] sm:$0xff] %vm1010_vm5, %v1094_v57 }
 0x54a   : > { %v1092_v58 = vpop.permute.xlu0 %1091 }
 0x54b   : > { %v1095_v59 = vmul.f32 %v1092_v58, %v1023_v48 }
 0x54d   : > { %1097 = vst.msk [vmem:[%s428_s13 + $0x8] sm:$0xff] %vm1010_vm5, %v1095_v59 }
 0x54e PF: > { %s14_s17 = sadd.s32 1, %s1491_s17   ;;  %s1790_s15 = smov %s1487_s16 }
 0x54f   : > { %p11_p5 = scmp.ge.s32.totalorder %s14_s17, 4   ;;  %s1791_s16 = smov %s1793_s18 }
 0x551   :  { %13 = sbr.rel (!%p11_p5) target bundleno = 2 (0x2), region = 92 }

</bundles_post_ra>
